<compile_context>
chip_gen: v5e
topology: v5e:2x2
jax: 0.10.0
libtpu: 0.0.40
codegen_flags: <defaults>
</compile_context>

<pallas_src>
import math

import jax
import jax.numpy as jnp
from jax.experimental import pallas as pl
from jax.experimental.pallas import tpu as pltpu


# ----------------------------------------------------------------------------
# Generation-aware VMEM sizing.
# ----------------------------------------------------------------------------
_FALLBACK_VMEM_CAP = 64 << 20  # conservative: v7x per-TC physical VMEM.


def _vmem_capacity_bytes() -> int:
    """Physical VMEM per TensorCore (128 MiB v5e/v6e, 64 MiB v7x)."""
    try:
        return int(pltpu.get_tpu_info().vmem_capacity_bytes)
    except Exception:
        return _FALLBACK_VMEM_CAP


def _sublane_min(dtype) -> int:
    """Minimum useful second-to-last block dim given sublane packing."""
    itemsize = jnp.dtype(dtype).itemsize
    return {4: 8, 2: 16, 1: 32}.get(itemsize, 8)


def _pick_tile_rows(rows: int, cols: int, dtype, per_buffer_budget: int) -> int:
    """Row tile that (a) fits the per-buffer VMEM budget and (b) yields >= ~8
    grid steps so both v7x TensorCores get work and the pipeline has depth."""
    itemsize = jnp.dtype(dtype).itemsize
    smin = _sublane_min(dtype)
    row_bytes = max(1, cols * itemsize)
    # Largest tile (multiple of the sublane minimum) fitting the budget.
    max_tile = max(smin, (per_buffer_budget // row_bytes) // smin * smin)
    # Smallest tile that still keeps the step count around ~8.
    target = pl.cdiv(rows, 8)
    target = pl.cdiv(target, smin) * smin
    return int(max(smin, min(max_tile, target)))


# ----------------------------------------------------------------------------
# 1) True identity: single HBM -> HBM DMA (no VMEM round trip, no grid).
# ----------------------------------------------------------------------------
def _dma_identity_kernel(x_hbm_ref, o_hbm_ref, sem):
    copy = pltpu.make_async_copy(x_hbm_ref, o_hbm_ref, sem)
    copy.start()
    copy.wait()


def pallas_passthrough(x: jax.Array) -> jax.Array:
    """Identity pass-through for an arbitrary-shaped array via one DMA."""
    return pl.pallas_call(
        _dma_identity_kernel,
        out_shape=jax.ShapeDtypeStruct(x.shape, x.dtype),
        in_specs=[pl.BlockSpec(memory_space=pl.ANY)],
        out_specs=pl.BlockSpec(memory_space=pl.ANY),
        scratch_shapes=[pltpu.SemaphoreType.DMA],
    )(x)


# ----------------------------------------------------------------------------
# 2) VMEM-tiled elementwise template (what a subclass's activation ops reuse).
# ----------------------------------------------------------------------------
def _elementwise_kernel(x_ref, o_ref):
    # TODO(synk): a concrete subclass replaces this body with its real
    # elementwise compute (e.g. decoder output activation); the identity is
    # kept only so the template compiles and is testable.
    o_ref[...] = x_ref[...]


def _as_2d(x: jax.Array):
    """Collapse to a layout-friendly 2-D slab without padding."""
    if x.ndim == 0:
        return x.reshape(1, 1)
    if x.ndim == 1:
        n = int(x.shape[0])
        if n >= 128 and n % 128 == 0:
            return x.reshape(n // 128, 128)   # lane-dense, no 128x inflation
        return x.reshape(1, n)
    rows = int(math.prod(x.shape[:-1]))
    return x.reshape(rows, int(x.shape[-1]))


def pallas_vmem_elementwise(x: jax.Array, *, single_block_max_bytes=None) -> jax.Array:
    orig_shape = x.shape
    x2d = _as_2d(x)
    rows, cols = int(x2d.shape[0]), int(x2d.shape[1])
    dtype = x2d.dtype
    itemsize = jnp.dtype(dtype).itemsize
    nbytes = rows * cols * itemsize

    vmem_cap = _vmem_capacity_bytes()
    # ~8 MiB/buffer on v5e/v6e (128 MiB VMEM), ~4 MiB/buffer on v7x (64 MiB).
    per_buffer_budget = max(1 << 20, vmem_cap // 16)
    # 2 in + 2 out double buffers (~= vmem_cap/4) stay well under this limit.
    vmem_limit = int(vmem_cap // 2)
    if single_block_max_bytes is None:
        single_block_max_bytes = vmem_cap // 8

    smin = _sublane_min(dtype)
    if nbytes <= single_block_max_bytes or rows <= 8 * smin:
        # Single block, no grid: one DMA in, one DMA out, zero per-step
        # pipeline overhead.  Whole slab (in + out) fits comfortably in VMEM.
        y2d = pl.pallas_call(
            _elementwise_kernel,
            out_shape=jax.ShapeDtypeStruct((rows, cols), dtype),
            in_specs=[pl.BlockSpec(memory_space=pltpu.MemorySpace.VMEM)],
            out_specs=pl.BlockSpec(memory_space=pltpu.MemorySpace.VMEM),
            compiler_params=pltpu.CompilerParams(vmem_limit_bytes=vmem_limit),
        )(x2d)
        return y2d.reshape(orig_shape)

    # Large slab: 1-D "parallel" grid over rows; last block may be ragged
    # (Pallas masks it), so no divisibility constraint on `rows`.
    # TODO(synk): additionally tile the lane axis if a single row chunk ever
    # exceeds the per-buffer budget; not needed for this placeholder.
    tile_rows = _pick_tile_rows(rows, cols, dtype, per_buffer_budget)
    grid = (pl.cdiv(rows, tile_rows),)
    y2d = pl.pallas_call(
        _elementwise_kernel,
        out_shape=jax.ShapeDtypeStruct((rows, cols), dtype),
        grid=grid,
        in_specs=[pl.BlockSpec((tile_rows, cols), lambda i: (i, 0))],
        out_specs=pl.BlockSpec((tile_rows, cols), lambda i: (i, 0)),
        compiler_params=pltpu.CompilerParams(
            dimension_semantics=("parallel",),
            vmem_limit_bytes=vmem_limit,
        ),
    )(x2d)
    return y2d.reshape(orig_shape)


# ----------------------------------------------------------------------------
# BaseVAE: faithful JAX mirror of the abstract PyTorch base class.
# ----------------------------------------------------------------------------
class BaseVAE:
    """Abstract VAE base class (JAX port of models/base.py BaseVAE)."""

    def __init__(self, *args, **kws):
        # PyTorch __init__ registers no parameters; nothing to initialize.
        pass

    def forward(self, *args, **kws):
        raise NotImplementedError('not implemented')

    # Make the object callable like an nn.Module.
    def __call__(self, *args, **kws):
        return self.forward(*args, **kws)

    def encode(self, *args, **kws):
        raise NotImplementedError('not implemented')

    def decode(self, *args, **kws):
        raise NotImplementedError('not implemented')

    def infer(self, *args, **kws):
        raise NotImplementedError('not implemented')

    def _sample_latent(self, *args, **kws):
        raise NotImplementedError('not implemented')

    def get_loss(self, *args, **kws):
        raise NotImplementedError('not implemented')


if __name__ == "__main__":
    key = jax.random.PRNGKey(0)
    # Small NCHW input consistent with a VAE image model.
    N, C, H, W = 2, 4, 16, 16
    x = jax.random.normal(key, (N, C, H, W), dtype=jnp.float32)

    # 1) Semantics check: every BaseVAE method must raise NotImplementedError.
    model = BaseVAE()
    for fn in (model.forward, model.encode, model.decode, model.infer,
               model._sample_latent, model.get_loss):
        raised = False
        try:
            fn(x)
        except NotImplementedError:
            raised = True
        assert raised, f"{fn.__name__} should raise NotImplementedError"

    # 2) HBM->HBM DMA identity on the image-shaped input.
    y = jax.block_until_ready(pallas_passthrough(x))
    assert y.shape == x.shape
    assert jnp.allclose(y, x), "DMA pass-through mismatch"

    # 3) HBM->HBM DMA identity on a latent-like (batch, dim) tensor whose last
    #    dim is not a multiple of 128 (no padding anywhere).
    z = jax.random.normal(key, (2, 64), dtype=jnp.float32)
    z_out = jax.block_until_ready(pallas_passthrough(z))
    assert jnp.allclose(z_out, z), "latent DMA pass-through mismatch"

    # 4) VMEM elementwise template, single-block path (whole slab in VMEM).
    w = jax.block_until_ready(pallas_vmem_elementwise(x))
    assert jnp.allclose(w, x), "single-block VMEM template mismatch"

    # 5) VMEM elementwise template, gridded path with a ragged (masked) last
    #    block: 200 rows do not divide the 32-row tile.  The small threshold
    #    is forced to 0 so the test stays tiny while covering the grid code.
    g = jax.random.normal(key, (200, 256), dtype=jnp.float32)
    g_out = jax.block_until_ready(
        pallas_vmem_elementwise(g, single_block_max_bytes=0))
    assert jnp.allclose(g_out, g), "gridded VMEM template mismatch"

    print("KERNEL_OK")
</pallas_src>

<mosaic_0001>
module attributes {stable_mosaic.version = 11 : i64} {
  func.func @_dma_identity_kernel(%arg0: memref<2x4x16x16xf32, #tpu.memory_space<any>>, %arg1: memref<2x4x16x16xf32, #tpu.memory_space<any>>, %arg2: memref<!tpu.dma_semaphore, #tpu.memory_space<semaphore_mem>>) attributes {dimension_semantics = [], scalar_prefetch = 0 : i64, scratch_operands = 1 : i64, tpu.core_type = #tpu.core_type<tc>} {
    tpu.enqueue_dma source(%arg0 : memref<2x4x16x16xf32, #tpu.memory_space<any>>) target(%arg1 : memref<2x4x16x16xf32, #tpu.memory_space<any>>) target_semaphore(%arg2 : memref<!tpu.dma_semaphore, #tpu.memory_space<semaphore_mem>>)
    tpu.wait_dma2 semaphore(%arg2 : memref<!tpu.dma_semaphore, #tpu.memory_space<semaphore_mem>>) src(%arg0 : memref<2x4x16x16xf32, #tpu.memory_space<any>>) dst(%arg1 : memref<2x4x16x16xf32, #tpu.memory_space<any>>)
    return
  }
}

</mosaic_0001>

<bundles_post_ra>
// kernel: tpu_custom_call.1
= control target key start
LH: loop header
LB: loop body
LE: loop exit
PB: predicated region body
PF: predicated region fallthrough
CT: control target
= control target key end

     0   :  { %s34_s12 = smov [#allocation2]   ;;  %s35_s13 = smov [#allocation3]   ;;  %s53_s0 = inlined_call_operand.hbm [shape: f32[2,4,16,16], index: 0, kind: input, shape index: {}]   ;;  %s54_s1 = inlined_call_operand.hbm [shape: f32[2,4,16,16], index: 1, kind: output, shape index: {}]  }
   0x1   :  { %s10_s8 = sshll.u32 %s53_s0, 4  ;;  %s12_s11 = sshll.u32 %s54_s1, 4  ;;  %s11_s8 = int_to_ptr.hbm [resolvable:$true] %s10_s8  ;;  %s13_s11 = int_to_ptr.hbm [resolvable:$true] %s12_s11 }
   0x2   :  { %s36_s14 = smov 0  }
   0x3   :  { %16 = dma.general %s11_s8, 2048, %s13_s11, %s34_s12, %s35_s13, [#allocation4], %s36_s14, 0  }
   0x4   :  { %32 = dma.done.wait [#allocation2], 2048 }
   0x5   :  { %33 = vsyncadd [#allocation2], 4294965248 }
   0x6   :  { %22 = vsyncmov [#allocation2] }
   0x9   :  { %s23_s15 = vpop.sfrf %22 }
   0xa   :  { %p28_p0 = scmp.ne.s32.totalorder %s23_s15, 0 }
   0xc   :  { %27 = shalt.err (%p28_p0)  }

</bundles_post_ra>
